<compile_context>
chip_gen: v7x
topology: tpu7x:2x2x1
jax: 0.10.0
libtpu: 0.0.40
codegen_flags: <defaults>
</compile_context>

<pallas_src>
import functools
import math

import jax
import jax.numpy as jnp
from jax import lax
from jax.experimental import pallas as pl
from jax.experimental.pallas import tpu as pltpu


def _apply_activation(y, activation, approximate_gelu=False):
    if activation is None:
        return y
    if activation == "relu":
        return jnp.maximum(y, 0.0)
    if activation == "gelu":
        if approximate_gelu:
            # tanh-approximate GELU: uses the (otherwise idle) EUP slot.
            c = math.sqrt(2.0 / math.pi)
            return 0.5 * y * (1.0 + jnp.tanh(c * (y + 0.044715 * y * y * y)))
        # PyTorch nn.GELU() default = exact (erf-based) GELU.
        return 0.5 * y * (1.0 + lax.erf(y * (1.0 / math.sqrt(2.0))))
    if activation == "tanh":
        return jnp.tanh(y)
    raise ValueError(f"unknown activation: {activation}")


def _linear_block_kernel(x_ref, w_ref, b_ref, o_ref, acc_ref, *,
                         activation, approximate_gelu, precision,
                         x_resident, tk):
    # x_ref: [tm, tk]  (or [tm, K_pad] when x_resident)
    # w_ref: [tn, tk]  (PyTorch [out, in] layout -> NT contraction)
    # b_ref: [1,  tn]   o_ref: [tm, tn]   acc_ref: [tm, tn] f32 scratch
    kstep = pl.program_id(2)

    @pl.when(kstep == 0)
    def _():
        acc_ref[...] = jnp.zeros_like(acc_ref)

    if x_resident:
        start = pl.multiple_of(kstep * tk, 128)
        x = x_ref[:, pl.ds(start, tk)]
    else:
        x = x_ref[...]

    # NT matmul: contract x[tm,tk] with w[tn,tk] on their last dims -> [tm,tn].
    acc_ref[...] += lax.dot_general(
        x, w_ref[...],
        dimension_numbers=(((1,), (1,)), ((), ())),
        preferred_element_type=jnp.float32,
        precision=precision,
    )

    @pl.when(kstep == pl.num_programs(2) - 1)
    def _():
        # Epilogue in f32 (bias + activation), cast once at the store.
        y = acc_ref[...] + b_ref[...].astype(jnp.float32)
        y = _apply_activation(y, activation, approximate_gelu)
        o_ref[...] = y.astype(o_ref.dtype)


def _round_up(x, m):
    return ((x + m - 1) // m) * m


def _cdiv(a, b):
    return -(-a // b)


def _fit_tile(dim, align, cap):
    """Aligned tile <= cap that keeps padding of `dim` modest."""
    d = _round_up(max(dim, 1), align)
    if d <= cap:
        return d
    nblocks = _cdiv(d, cap)
    return _round_up(_cdiv(d, nblocks), align)


def _chip_config():
    """(vmem_limit_bytes, tk_cap, x_resident_budget_bytes) for this chip."""
    vmem_cap = 64 * 1024 * 1024  # conservative default (v7x per-TC)
    try:
        info = pltpu.get_tpu_info()
        vmem_cap = int(getattr(info, "vmem_capacity_bytes", vmem_cap)) or vmem_cap
    except Exception:
        pass
    big_vmem = vmem_cap >= 100 * 1024 * 1024      # v5e / v6e have 128 MiB
    vmem_limit = (vmem_cap * 3) // 4              # ~96 MiB big chips, ~48 MiB v7x
    tk_cap = 1024 if big_vmem else 512
    x_budget = (8 if big_vmem else 4) * 1024 * 1024
    return vmem_limit, tk_cap, x_budget


def linear_block(x, weight, bias, activation=None, *,
                 compute_dtype=jnp.bfloat16,
                 precision=None,
                 approximate_gelu=False,
                 use_pallas=None):
    """y = activation(x @ weight.T + bias), matching PyTorch nn.Linear.

    x:      [..., channels_in]
    weight: [channels_out, channels_in]   (PyTorch layout, NOT transposed)
    bias:   [channels_out]

    compute_dtype: dtype the MXU operands are cast to (default bf16 — full
        MXU rate, half the HBM traffic; accumulation stays f32).  Pass None
        to keep the input dtype (combine with precision=HIGHEST for a
        bit-faithful f32 result).
    """
    cin = x.shape[-1]
    cout = weight.shape[0]
    assert weight.shape == (cout, cin)
    assert bias.shape == (cout,)

    lead_shape = x.shape[:-1]
    m = math.prod(lead_shape) if lead_shape else 1
    out_dtype = x.dtype

    if use_pallas is None:
        # Sub-tile problems: a plain jnp matmul beats the padded Pallas launch.
        use_pallas = max(m, cin, cout) >= 256

    if not use_pallas:
        y = jnp.dot(x.reshape(m, cin), weight.T,
                    preferred_element_type=jnp.float32) + bias
        y = _apply_activation(y, activation, approximate_gelu)
        return y.astype(out_dtype).reshape(*lead_shape, cout)

    cdt = jnp.dtype(compute_dtype) if compute_dtype is not None else jnp.dtype(x.dtype)
    itemsize = cdt.itemsize
    sublane = max(8, 32 // itemsize)          # 8 f32 / 16 bf16 / 32 int8,fp8

    # TODO(synk): for repeated calls, cast/pad the weight once outside the hot
    # path and pass it pre-prepared to avoid the per-call cast/pad HBM pass.
    x2d = x.reshape(m, cin).astype(cdt)
    w2d = weight.astype(cdt)                  # stays [N, K]; no transpose pass
    b2d = bias.reshape(1, cout).astype(jnp.float32)

    vmem_limit, tk_cap, x_budget = _chip_config()
    tm_cap, tn_cap = 512, 1024

    tm = _fit_tile(m, sublane, tm_cap)
    tk = _fit_tile(cin, 128, tk_cap)
    tn = _fit_tile(cout, 128, tn_cap)
    m_pad = _round_up(m, tm)
    k_pad = _round_up(cin, tk)
    n_pad = _round_up(cout, tn)

    # Megacore (v7x has 2 TCs): make sure a "parallel" axis has >= 2 blocks
    # when the problem is big enough to split.
    if m_pad // tm == 1 and n_pad // tn == 1:
        if m >= 2 * sublane:
            tm = _round_up(_cdiv(m, 2), sublane)
            m_pad = _round_up(m, tm)
        elif cout >= 256:
            tn = _round_up(_cdiv(cout, 2), 128)
            n_pad = _round_up(cout, tn)

    # Zero-pad only the dims that need it (zeros contribute nothing to the
    # dot; padded output rows/cols are sliced off below).
    if (m_pad, k_pad) != (m, cin):
        x2d = jnp.pad(x2d, ((0, m_pad - m), (0, k_pad - cin)))
    if (n_pad, k_pad) != (cout, cin):
        w2d = jnp.pad(w2d, ((0, n_pad - cout), (0, k_pad - cin)))
    if n_pad != cout:
        b2d = jnp.pad(b2d, ((0, 0), (0, n_pad - cout)))

    grid_m = m_pad // tm
    grid_n = n_pad // tn
    grid_k = k_pad // tk
    grid = (grid_m, grid_n, grid_k)

    # Keep the x row-panel resident across the N axis when it fits a few MiB:
    # fetched once per i instead of once per (j, k) step.
    x_resident = grid_n > 1 and tm * k_pad * itemsize <= x_budget
    if x_resident:
        x_spec = pl.BlockSpec((tm, k_pad), lambda i, j, kk: (i, 0))
    else:
        x_spec = pl.BlockSpec((tm, tk), lambda i, j, kk: (i, kk))

    out_itemsize = jnp.dtype(out_dtype).itemsize
    cost = pl.CostEstimate(
        flops=2 * m_pad * n_pad * k_pad,
        transcendentals=(m_pad * n_pad) if activation in ("gelu", "tanh") else 0,
        bytes_accessed=(x2d.size + w2d.size + b2d.size) * itemsize
        + m_pad * n_pad * out_itemsize,
    )

    kernel = functools.partial(
        _linear_block_kernel,
        activation=activation,
        approximate_gelu=approximate_gelu,
        precision=precision,
        x_resident=x_resident,
        tk=tk,
    )

    out = pl.pallas_call(
        kernel,
        out_shape=jax.ShapeDtypeStruct((m_pad, n_pad), out_dtype),
        grid_spec=pltpu.PrefetchScalarGridSpec(
            num_scalar_prefetch=0,
            grid=grid,
            in_specs=[
                x_spec,                                            # x tile / panel
                pl.BlockSpec((tn, tk), lambda i, j, kk: (j, kk)),  # W [N,K] tile
                pl.BlockSpec((1, tn), lambda i, j, kk: (0, j)),    # bias tile
            ],
            out_specs=pl.BlockSpec((tm, tn), lambda i, j, kk: (i, j)),
            scratch_shapes=[pltpu.VMEM((tm, tn), jnp.float32)],
        ),
        compiler_params=pltpu.CompilerParams(
            dimension_semantics=("parallel", "parallel", "arbitrary"),
            vmem_limit_bytes=vmem_limit,
        ),
        cost_estimate=cost,
    )(x2d, w2d, b2d)

    out = out[:m, :cout]
    return out.reshape(*lead_shape, cout)


def init_linear_block_params(key, channels_in, channels_out):
    """Deterministic xavier_uniform weight + zero bias (matches _init_weights)."""
    limit = math.sqrt(6.0 / (channels_in + channels_out))
    weight = jax.random.uniform(
        key, (channels_out, channels_in), minval=-limit, maxval=limit,
        dtype=jnp.float32,
    )
    bias = jnp.zeros((channels_out,), dtype=jnp.float32)
    return weight, bias


if __name__ == "__main__":
    batch, seq = 2, 8
    channels_in, channels_out = 32, 32
    activation = "gelu"

    key = jax.random.PRNGKey(0)
    kx, kw = jax.random.split(key)

    x = jax.random.normal(kx, (batch, seq, channels_in), dtype=jnp.float32)
    weight, bias = init_linear_block_params(kw, channels_in, channels_out)

    # Pure-JAX reference (exact erf GELU, like nn.GELU()).
    ref = x @ weight.T + bias
    ref = 0.5 * ref * (1.0 + lax.erf(ref / math.sqrt(2.0)))

    # 1) Default fast path: bf16 operands, f32 accumulator.  The demo shape is
    #    below the fallback threshold, so force the Pallas path to exercise
    #    the kernel; tolerance reflects the bf16 operand cast.
    y = linear_block(x, weight, bias, activation=activation, use_pallas=True)
    y = jax.block_until_ready(y)
    assert y.shape == (batch, seq, channels_out)
    assert jnp.allclose(y, ref, atol=5e-2, rtol=5e-2), "bf16 path mismatch"

    # 2) Bit-faithful mode: f32 operands + HIGHEST MXU precision.
    y32 = linear_block(x, weight, bias, activation=activation, use_pallas=True,
                       compute_dtype=None, precision=lax.Precision.HIGHEST)
    y32 = jax.block_until_ready(y32)
    assert jnp.allclose(y32, ref, atol=1e-5, rtol=1e-5), "f32 path mismatch"

    print("KERNEL_OK")
</pallas_src>

<mosaic_0001>
module attributes {stable_mosaic.version = 11 : i64} {
  func.func @_linear_block_kernel(%arg0: i32, %arg1: i32, %arg2: i32, %arg3: memref<16x128xbf16, #tpu.memory_space<vmem>>, %arg4: memref<128x128xbf16, #tpu.memory_space<vmem>>, %arg5: memref<1x128xf32, #tpu.memory_space<vmem>>, %arg6: memref<16x128xf32, #tpu.memory_space<vmem>>, %arg7: memref<16x128xf32, #tpu.memory_space<vmem>>) attributes {dimension_semantics = [#tpu.dimension_semantics<parallel>, #tpu.dimension_semantics<parallel>, #tpu.dimension_semantics<arbitrary>], iteration_bounds = array<i64: 1, 1, 1>, scalar_prefetch = 0 : i64, scratch_operands = 1 : i64, tpu.core_type = #tpu.core_type<tc>, window_params = [{transform_indices = @transform_0, window_bounds = array<i64: 16, 128>}, {transform_indices = @transform_1, window_bounds = array<i64: 128, 128>}, {transform_indices = @transform_2, window_bounds = array<i64: 1, 128>}, {transform_indices = @transform_3, window_bounds = array<i64: 16, 128>}]} {
    %c0_i32 = arith.constant 0 : i32
    %0 = arith.cmpi eq, %arg2, %c0_i32 : i32
    %1 = arith.extui %0 : i1 to i32
    %c0_i32_0 = arith.constant 0 : i32
    %2 = arith.cmpi ne, %1, %c0_i32_0 : i32
    scf.if %2 {
      %cst_10 = arith.constant 0.000000e+00 : f32
      %12 = vector.broadcast %cst_10 : f32 to vector<16x128xf32>
      %c0_11 = arith.constant 0 : index
      %c0_12 = arith.constant 0 : index
      %13 = vector.load %arg7[%c0_11, %c0_12] : memref<16x128xf32, #tpu.memory_space<vmem>>, vector<16x128xf32>
      tpu.vector_store %arg7[%c0_11, %c0_12], %12 {strides = array<i32>} : memref<16x128xf32, #tpu.memory_space<vmem>>, vector<16x128xf32>,
    } else {
    }
    %c0 = arith.constant 0 : index
    %c0_1 = arith.constant 0 : index
    %3 = vector.load %arg3[%c0, %c0_1] : memref<16x128xbf16, #tpu.memory_space<vmem>>, vector<16x128xbf16>
    %c0_2 = arith.constant 0 : index
    %c0_3 = arith.constant 0 : index
    %4 = vector.load %arg7[%c0_2, %c0_3] : memref<16x128xf32, #tpu.memory_space<vmem>>, vector<16x128xf32>
    %c0_4 = arith.constant 0 : index
    %c0_5 = arith.constant 0 : index
    %5 = vector.load %arg4[%c0_4, %c0_5] : memref<128x128xbf16, #tpu.memory_space<vmem>>, vector<128x128xbf16>
    %cst = arith.constant dense<0.000000e+00> : vector<16x128xf32>
    %6 = tpu.matmul %3, %5, %cst {dimension_numbers = #tpu.dot_dimension_numbers<[1], [1], [0], [0], [0, 0, 1, 0], [], []>} : vector<16x128xbf16>, vector<128x128xbf16>, vector<16x128xf32> -> vector<16x128xf32>
    %7 = arith.addf %4, %6 : vector<16x128xf32>
    %c0_6 = arith.constant 0 : index
    %c0_7 = arith.constant 0 : index
    %8 = vector.load %arg7[%c0_6, %c0_7] : memref<16x128xf32, #tpu.memory_space<vmem>>, vector<16x128xf32>
    tpu.vector_store %arg7[%c0_6, %c0_7], %7 {strides = array<i32>} : memref<16x128xf32, #tpu.memory_space<vmem>>, vector<16x128xf32>,
    %c0_i32_8 = arith.constant 0 : i32
    %9 = arith.cmpi eq, %arg2, %c0_i32_8 : i32
    %10 = arith.extui %9 : i1 to i32
    %c0_i32_9 = arith.constant 0 : i32
    %11 = arith.cmpi ne, %10, %c0_i32_9 : i32
    scf.if %11 {
      %c0_10 = arith.constant 0 : index
      %c0_11 = arith.constant 0 : index
      %12 = vector.load %arg7[%c0_10, %c0_11] : memref<16x128xf32, #tpu.memory_space<vmem>>, vector<16x128xf32>
      %c0_12 = arith.constant 0 : index
      %c0_13 = arith.constant 0 : index
      %13 = vector.load %arg5[%c0_12, %c0_13] : memref<1x128xf32, #tpu.memory_space<vmem>>, vector<1x128xf32>
      %14 = vector.broadcast %13 : vector<1x128xf32> to vector<16x128xf32>
      %15 = arith.addf %12, %14 : vector<16x128xf32>
      %cst_14 = arith.constant 5.000000e-01 : f32
      %16 = vector.broadcast %cst_14 : f32 to vector<16x128xf32>
      %17 = arith.mulf %16, %15 : vector<16x128xf32>
      %cst_15 = arith.constant 0.707106769 : f32
      %18 = vector.broadcast %cst_15 : f32 to vector<16x128xf32>
      %19 = arith.mulf %15, %18 : vector<16x128xf32>
      %20 = math.erf %19 : vector<16x128xf32>
      %cst_16 = arith.constant 1.000000e+00 : f32
      %21 = vector.broadcast %cst_16 : f32 to vector<16x128xf32>
      %22 = arith.addf %21, %20 : vector<16x128xf32>
      %23 = arith.mulf %17, %22 : vector<16x128xf32>
      %c0_17 = arith.constant 0 : index
      %c0_18 = arith.constant 0 : index
      %24 = vector.load %arg6[%c0_17, %c0_18] : memref<16x128xf32, #tpu.memory_space<vmem>>, vector<16x128xf32>
      tpu.vector_store %arg6[%c0_17, %c0_18], %23 {strides = array<i32>} : memref<16x128xf32, #tpu.memory_space<vmem>>, vector<16x128xf32>,
    } else {
    }
    return
  }
  func.func @transform_0(%arg0: i32, %arg1: i32, %arg2: i32) -> (i32, i32) {
    %c0_i32 = arith.constant 0 : i32
    return %arg0, %arg2 : i32, i32
  }
  func.func @transform_1(%arg0: i32, %arg1: i32, %arg2: i32) -> (i32, i32) {
    %c0_i32 = arith.constant 0 : i32
    return %arg1, %arg2 : i32, i32
  }
  func.func @transform_2(%arg0: i32, %arg1: i32, %arg2: i32) -> (i32, i32) {
    %c0_i32 = arith.constant 0 : i32
    %c0_i32_0 = arith.constant 0 : i32
    return %c0_i32, %arg1 : i32, i32
  }
  func.func @transform_3(%arg0: i32, %arg1: i32, %arg2: i32) -> (i32, i32) {
    %c0_i32 = arith.constant 0 : i32
    return %arg0, %arg1 : i32, i32
  }
}

</mosaic_0001>

<bundles_post_ra>
// kernel: tpu_custom_call.1
= control target key start
LH: loop header
LB: loop body
LE: loop exit
PB: predicated region body
PF: predicated region fallthrough
CT: control target
= control target key end

     0   :  { %8 = vsyncpa [#allocation4], 0  ;;  %s414_s0 = inlined_call_operand.hbm [shape: bf16[16,128], index: 0, kind: input, shape index: {}]   ;;  %s415_s1 = inlined_call_operand.hbm [shape: bf16[128,128], index: 1, kind: input, shape index: {}]   ;;  %s416_s2 = inlined_call_operand.vmem [shape: f32[1,128], index: 2, kind: input, shape index: {}]   ;;  %s417_s3 = inlined_call_operand.hbm [shape: f32[16,128], index: 3, kind: output, shape index: {}]  }
   0x1   :  { %9 = vsyncpa [#allocation7], 0 }
   0x2   :  { %10 = vsyncpa [#allocation5], 0  ;;  %s346_s12 = smov [#allocation3]   ;;  %s274_s16 = scalar_lea.hbm %s414_s0, 128 }
   0x3   :  { %s16_s13 = sshll.u32 %s346_s12, 4  ;;  %p275_p0 = scmp.ne.s32.totalorder %s414_s0, %s274_s16  ;;  %s17_s13 = int_to_ptr.vmem [resolvable:$true] %s16_s13 }
   0x4   :  { %p278_p1 = scmp.lt.u32.totalorder %s274_s16, %s414_s0 }
   0x6   :  { %p280_p2 = pnand %p278_p1, %p275_p0 }
   0x8   :  { %283 = shalt.err (!%p280_p2)
}
   0x9   :  { %s284_s21 = scalar_lea.vmem %s17_s13, 128  ;;  %p289_p4 = scmp.lt.s32.totalorder %s17_s13, %s17_s13 }
   0xa   :  { %p285_p3 = scmp.ne.s32.totalorder %s17_s13, %s284_s21  ;;  %p290_p5 = scmp.lt.s32.totalorder %s284_s21, %s284_s21 }
   0xc   :  { %p291_p6 = por %p290_p5, %p289_p4 }
   0xe   :  { %p292_p7 = pnand %p291_p6, %p285_p3 }
  0x10   :  { %295 = shalt.err (!%p292_p7)
}
  0x11   :  { %s347_s22 = smov 64   ;;  %s348_s23 = smov 4  }
  0x12   :  { %22 = dma.hbm_to_vmem [thread:$0]  %s414_s0, 128, %s17_s13, [#allocation4], %s347_s22, %s347_s22, %s348_s23  }
  0x13   :  { %s349_s26 = smov [#allocation6]   ;;  %s296_s30 = scalar_lea.hbm %s415_s1, 1024 }
  0x14   :  { %s28_s27 = sshll.u32 %s349_s26, 4  ;;  %p297_p8 = scmp.ne.s32.totalorder %s415_s1, %s296_s30  ;;  %s29_s27 = int_to_ptr.vmem [resolvable:$true] %s28_s27 }
  0x15   :  { %p300_p9 = scmp.lt.u32.totalorder %s296_s30, %s415_s1 }
  0x17   :  { %p302_p10 = pnand %p300_p9, %p297_p8 }
  0x19   :  { %305 = shalt.err (!%p302_p10)
}
  0x1a   :  { %s306_s8 = scalar_lea.vmem %s29_s27, 1024  ;;  %p311_p12 = scmp.lt.s32.totalorder %s29_s27, %s29_s27 }
  0x1b   :  { %p307_p11 = scmp.ne.s32.totalorder %s29_s27, %s306_s8  ;;  %p312_p13 = scmp.lt.s32.totalorder %s306_s8, %s306_s8 }
  0x1d   :  { %p313_p0 = por %p312_p13, %p311_p12 }
  0x1f   :  { %p314_p1 = pnand %p313_p0, %p307_p11 }
  0x21   :  { %317 = shalt.err (!%p314_p1)
}
  0x22   :  { %34 = dma.hbm_to_vmem [thread:$0]  %s415_s1, 1024, %s29_s27, [#allocation7], %s347_s22, %s347_s22, %s348_s23  }
  0x23   :  { %340 = dma.done.wait [#allocation4], 128  }
  0x24   :  { %341 = vsyncadd [#allocation4], 4294967168 }
  0x25   :  { %342 = dma.done.wait [#allocation7], 1024  }
  0x26   :  { %343 = vsyncadd [#allocation7], 4294966272  ;;  %v350_v0 = vmov 0.0   ;;  %vm351_vm0 = vmmov 0   ;;  %v261_v1 = vld [vmem:[#allocation6] sm:$0xff]   ;;  %v262_v2 = vld [vmem:[#allocation6 + $0x8] sm:$0xff]  }
  0x27   :  { %232 = vmatprep.subr.bf16.mxu0 %v350_v0  ;;  %248 = vmatprep.mubr.msk.bf16.mxu0 %vm351_vm0, %v350_v0  ;;  %v263_v3 = vld [vmem:[#allocation6 + $0x10] sm:$0xff]   ;;  %v264_v4 = vld [vmem:[#allocation6 + $0x18] sm:$0xff]   ;;  %v265_v5 = vld [vmem:[#allocation6 + $0x20] sm:$0xff]   ;;  %s352_s11 = smov [#allocation8]  }
  0x28   :  { %233 = vmatpush3.bf16.xpose.msra.mxu0 %v261_v1  ;;  %v266_v6 = vld [vmem:[#allocation6 + $0x28] sm:$0xff]   ;;  %v267_v7 = vld [vmem:[#allocation6 + $0x30] sm:$0xff]   ;;  %v268_v8 = vld [vmem:[#allocation6 + $0x38] sm:$0xff]   ;;  %s200_s12 = sshll.u32 %s352_s11, 4  ;;  %s201_s12 = int_to_ptr.vmem [resolvable:$true] %s200_s12 }
  0x29   :  { %234 = vmatprep.subr.bf16.mxu0 %v350_v0  ;;  %v269_v9 = vld [vmem:[#allocation3] sm:$0xff]   ;;  %p323_p3 = scmp.lt.s32.totalorder %s201_s12, %s201_s12 }
  0x2a   :  { %v222_v10 = vld [vmem:[%s416_s2] ss:$0 sm:$0xff]  ;;  %s318_s2 = scalar_lea.vmem %s201_s12, 256 }
  0x2b   :  { %p319_p2 = scmp.ne.s32.totalorder %s201_s12, %s318_s2  ;;  %p324_p4 = scmp.lt.s32.totalorder %s318_s2, %s318_s2 }
  0x2d   :  { %p325_p5 = por %p324_p4, %p323_p3 }
  0x2f   :  { %p326_p6 = pnand %p325_p5, %p319_p2 }
  0x30   :  { %235 = vmatpush3.bf16.xpose.msra.mxu0 %v262_v2 }
  0x31   :  { %236 = vmatprep.subr.bf16.mxu0 %v350_v0 }
  0x38   :  { %237 = vmatpush3.bf16.xpose.msra.mxu0 %v263_v3 }
  0x39   :  { %238 = vmatprep.subr.bf16.mxu0 %v350_v0 }
  0x40   :  { %239 = vmatpush3.bf16.xpose.msra.mxu0 %v264_v4 }
  0x41   :  { %240 = vmatprep.subr.bf16.mxu0 %v350_v0 }
  0x48   :  { %241 = vmatpush3.bf16.xpose.msra.mxu0 %v265_v5 }
  0x49   :  { %242 = vmatprep.subr.bf16.mxu0 %v350_v0 }
  0x50   :  { %243 = vmatpush3.bf16.xpose.msra.mxu0 %v266_v6 }
  0x51   :  { %244 = vmatprep.subr.bf16.mxu0 %v350_v0 }
  0x58   :  { %245 = vmatpush3.bf16.xpose.msra.mxu0 %v267_v7 }
  0x59   :  { %246 = vmatprep.subr.bf16.mxu0 %v350_v0 }
  0x60   :  { %247 = vmatpush3.bf16.xpose.msra.mxu0 %v268_v8 }
  0x67   :  { %249 = vmatmul.mubr.bf16.vlgmr.msra.gmra.mrb[0].mxu0 %v269_v9 }
 0x13a   :  { %v158_v11 = vpop.f32.mrb[0].mxu0 }
 0x13b   :  { %v181_v12 = vadd.f32 %v222_v10, %v158_v11  ;;  %v250_v13 = vpop.f32.mrb[1].mxu0 }
 0x13c   :  { %v161_v14 = vpop.f32.mrb[2].mxu0 }
 0x13d   :  { %v185_v15 = vmul.f32 0.70710677, %v181_v12  ;;  %v182_v16 = vadd.f32 %v222_v10, %v161_v14  ;;  %v251_v17 = vpop.f32.mrb[3].mxu0  ;;  %v183_v20 = vmul.f32 0.5, %v181_v12 }
 0x13f   :  { %270 = verf.f32 %v185_v15  ;;  %v186_v18 = vmul.f32 0.70710677, %v182_v16  ;;  %v184_v24 = vmul.f32 0.5, %v182_v16 }
 0x141   :  { %272 = verf.f32 %v186_v18 }
 0x149   :  { %v271_v19 = vpop.eup %270 }
 0x14a   :  { %v189_v21 = vadd.f32 1.0, %v271_v19 }
 0x14b   :  { %v273_v22 = vpop.eup %272 }
 0x14c   :  { %v191_v23 = vmul.f32 %v189_v21, %v183_v20  ;;  %v190_v25 = vadd.f32 1.0, %v273_v22 }
 0x14e   :  { %193 = vst [vmem:[#allocation8] sm:$0xff] %v191_v23  ;;  %v192_v26 = vmul.f32 %v190_v25, %v184_v24 }
 0x150   :  { %194 = vst [vmem:[#allocation8 + $0x8] sm:$0xff] %v192_v26 }
 0x151   :  { %329 = shalt.err (!%p326_p6)
}
 0x152   :  { %s330_s15 = scalar_lea.hbm %s417_s3, 256 }
 0x153   :  { %p331_p7 = scmp.ne.s32.totalorder %s417_s3, %s330_s15  ;;  %p334_p8 = scmp.lt.u32.totalorder %s330_s15, %s417_s3 }
 0x155   :  { %p336_p9 = pnand %p334_p8, %p331_p7 }
 0x157   :  { %339 = shalt.err (!%p336_p9)
}
 0x158   :  { %s353_s20 = smov 128   ;;  %s354_s21 = smov 8  }
 0x159   :  { %206 = dma.vmem_to_hbm [thread:$0]  %s201_s12, 256, %s417_s3, [#allocation5], %s353_s20, %s353_s20, %s354_s21  }
 0x15a   :  { %344 = dma.done.wait [#allocation5], 256  }
 0x15b   :  { %345 = vsyncadd [#allocation5], 4294967040 }
 0x15c   :  { %210 = vsyncpa [#allocation4], 1 }
 0x15d   :  { %211 = vsyncpa [#allocation7], 1 }
 0x15e   :  { %212 = vsyncpa [#allocation5], 1 }

</bundles_post_ra>
